<compile_context>
chip_gen: v7x
topology: tpu7x:2x2x1
jax: 0.10.0
libtpu: 0.0.40
codegen_flags: <defaults>
</compile_context>

<pallas_src>
import jax
import jax.numpy as jnp
from jax.experimental import pallas as pl
from jax.experimental.pallas import tpu as pltpu

LANE = 128
BN_EPS = 1e-5


def _round_up(x, m):
    return (x + m - 1) // m * m


def _pick_tile(requested, total):
    """Largest multiple of LANE that is <= requested and divides `total` (total % LANE == 0)."""
    t = max(LANE, min(requested, total))
    t = (t // LANE) * LANE
    while total % t != 0:
        t -= LANE
    return t


# ---------------------------------------------------------------------------
# Pass 1: g = dinv_row * (relu(x * scale + shift) @ W)
#   - affine BatchNorm with precomputed per-channel scale/shift (f32 VPU math)
#   - ReLU; Dropout(p=0.0) == identity
#   - GCN weight matmul folded in (small (tr,Cin)x(Cin,Cout) MXU op per row tile)
#   - D^-1/2 "column side" scaling of the aggregation applied here
#   - bf16 output slab for the MXU in pass 2
# ---------------------------------------------------------------------------
def bn_relu_proj_kernel(x_ref, scale_ref, shift_ref, w_ref, dinv_ref, g_ref):
    h = jnp.maximum(x_ref[...] * scale_ref[...] + shift_ref[...], 0.0)
    g = jnp.dot(h, w_ref[...], preferred_element_type=jnp.float32)
    g_ref[...] = (g * dinv_ref[...]).astype(g_ref.dtype)


# ---------------------------------------------------------------------------
# Pass 2: out[i,:] = dinv[i] * (sum_k A[i,k] @ g[k,:]) + b
#   grid = (row tiles i, reduction tiles k); reduction axis last ("arbitrary").
#   f32 accumulator scratch; dinv row scale + bias applied once at k == last.
#   A is streamed as raw bf16 edge counts (exact small integers), g is either
#   fully VMEM-resident (sliced with pl.ds) or streamed per k tile.
# ---------------------------------------------------------------------------
def make_agg_kernel(tk, g_resident):
    def kernel(a_ref, g_ref, dinv_ref, b_ref, o_ref, acc_ref):
        k = pl.program_id(1)

        @pl.when(k == 0)
        def _():
            acc_ref[...] = jnp.zeros_like(acc_ref)

        if g_resident:
            start = pl.multiple_of(k * tk, LANE)
            g_blk = g_ref[pl.ds(start, tk), :]
        else:
            g_blk = g_ref[...]

        # bf16 x bf16 -> f32 accumulation on the MXU.
        acc_ref[...] += jnp.dot(a_ref[...], g_blk, preferred_element_type=jnp.float32)

        @pl.when(k == pl.num_programs(1) - 1)
        def _():
            o_ref[...] = (acc_ref[...] * dinv_ref[...] + b_ref[...]).astype(o_ref.dtype)

    return kernel


def basic_gcn_block(x, edge_index, w, b, gamma, beta, *,
                    tm=1024, tk=1024, tr=1024, g_resident=None):
    """x: [N, Cin] f32, edge_index: [2, E] int32 (row 0 = src, row 1 = dst)."""
    N, Cin = x.shape
    Cout = w.shape[1]

    # ---- padded, lane-dense sizes; pad N only to the 128 granule ----
    Cin_p = _round_up(Cin, LANE)
    Cout_p = _round_up(Cout, LANE)
    N_p = _round_up(N, LANE)
    tm = _pick_tile(tm, N_p)
    tk = _pick_tile(tk, N_p)
    tr = _pick_tile(tr, N_p)
    assert N_p % tm == 0 and N_p % tk == 0 and N_p % tr == 0

    # ---- cheap O(N*Cin + E) plain-JAX glue ----
    # BatchNorm1d training-mode batch statistics (biased variance) folded to scale/shift.
    mean = jnp.mean(x, axis=0)
    var = jnp.mean((x - mean) ** 2, axis=0)
    scale = gamma * jax.lax.rsqrt(var + BN_EPS)
    shift = beta - mean * scale

    src, dst = edge_index[0], edge_index[1]
    ones_e = jnp.ones(src.shape, jnp.float32)
    # PyG add_remaining_self_loops: keep existing self loops (with multiplicity),
    # add a weight-1 loop only for nodes that have none.
    loop_cnt = jnp.zeros((N,), jnp.float32).at[dst].add(jnp.where(src == dst, 1.0, 0.0))
    add_loop = (loop_cnt == 0).astype(jnp.float32)
    # Degrees via O(E) segment-sum over edges (no dense row-sum).
    deg = jnp.zeros((N,), jnp.float32).at[dst].add(ones_e) + add_loop
    dinv = jnp.where(deg > 0, jax.lax.rsqrt(deg), 0.0)

    # Raw (unnormalized) adjacency counts scattered straight into the padded bf16 slab.
    # Counts are small integers -> exact in bf16; the D^-1/2 scaling is applied to g and
    # the output rows in the kernels, so no dense N^2 scaling pass is needed here.
    idx = jnp.arange(N)
    A_p = (jnp.zeros((N_p, N_p), jnp.bfloat16)
           .at[dst, src].add(ones_e.astype(jnp.bfloat16))
           .at[idx, idx].add(add_loop.astype(jnp.bfloat16)))

    x_p = jnp.zeros((N_p, Cin_p), jnp.float32).at[:N, :Cin].set(x)
    w_p = jnp.zeros((Cin_p, Cout_p), jnp.float32).at[:Cin, :Cout].set(w)
    b_p = jnp.zeros((1, Cout_p), jnp.float32).at[0, :Cout].set(b)
    scale_p = jnp.zeros((1, Cin_p), jnp.float32).at[0, :Cin].set(scale)
    shift_p = jnp.zeros((1, Cin_p), jnp.float32).at[0, :Cin].set(shift)
    dinv_p = jnp.zeros((N_p, 1), jnp.float32).at[:N, 0].set(dinv)  # padded rows -> 0

    # ---- pass 1: BN + ReLU + @W + row scale, row-tiled, bf16 output ----
    g_p = pl.pallas_call(
        bn_relu_proj_kernel,
        out_shape=jax.ShapeDtypeStruct((N_p, Cout_p), jnp.bfloat16),
        grid=(N_p // tr,),
        in_specs=[
            pl.BlockSpec((tr, Cin_p), lambda i: (i, 0)),
            pl.BlockSpec((1, Cin_p), lambda i: (0, 0)),
            pl.BlockSpec((1, Cin_p), lambda i: (0, 0)),
            pl.BlockSpec((Cin_p, Cout_p), lambda i: (0, 0)),
            pl.BlockSpec((tr, 1), lambda i: (i, 0)),
        ],
        out_specs=pl.BlockSpec((tr, Cout_p), lambda i: (i, 0)),
        compiler_params=pltpu.CompilerParams(
            dimension_semantics=("parallel",),
            vmem_limit_bytes=32 * 1024 * 1024),
    )(x_p, scale_p, shift_p, w_p, dinv_p)

    # ---- pass 2: tiled out = dinv * (A @ g) + b ----
    if g_resident is None:
        g_resident = (N_p * Cout_p * 2) <= (4 * 1024 * 1024)  # keep resident g small (v7x VMEM)
    g_spec = (pl.BlockSpec((N_p, Cout_p), lambda i, k: (0, 0)) if g_resident
              else pl.BlockSpec((tk, Cout_p), lambda i, k: (k, 0)))

    out_p = pl.pallas_call(
        make_agg_kernel(tk, g_resident),
        out_shape=jax.ShapeDtypeStruct((N_p, Cout_p), jnp.float32),
        grid_spec=pltpu.PrefetchScalarGridSpec(
            num_scalar_prefetch=0,
            grid=(N_p // tm, N_p // tk),
            in_specs=[
                pl.BlockSpec((tm, tk), lambda i, k: (i, k)),      # A tile (dominant HBM stream)
                g_spec,                                           # g: resident or per-k tile
                pl.BlockSpec((tm, 1), lambda i, k: (i, 0)),       # dinv rows
                pl.BlockSpec((1, Cout_p), lambda i, k: (0, 0)),   # bias (resident)
            ],
            out_specs=pl.BlockSpec((tm, Cout_p), lambda i, k: (i, 0)),
            scratch_shapes=[pltpu.VMEM((tm, Cout_p), jnp.float32)],
        ),
        compiler_params=pltpu.CompilerParams(
            dimension_semantics=("parallel", "arbitrary"),
            vmem_limit_bytes=48 * 1024 * 1024),
    )(A_p, g_p, dinv_p, b_p)

    return out_p[:N, :Cout]


def reference(x, edge_index, w, b, gamma, beta):
    """Pure-JAX f32 reference (PyG add_remaining_self_loops convention)."""
    N = x.shape[0]
    mean = x.mean(0, keepdims=True)
    var = ((x - mean) ** 2).mean(0, keepdims=True)
    h = (x - mean) * jax.lax.rsqrt(var + BN_EPS) * gamma + beta
    h = jnp.maximum(h, 0.0)
    src, dst = edge_index[0], edge_index[1]
    A = jnp.zeros((N, N), jnp.float32).at[dst, src].add(1.0)
    diag = jnp.diagonal(A)
    A = A + jnp.diag(jnp.where(diag == 0, 1.0, 0.0))
    deg = A.sum(1)
    dinv = jnp.where(deg > 0, 1.0 / jnp.sqrt(deg), 0.0)
    A_hat = A * dinv[:, None] * dinv[None, :]
    return A_hat @ (h @ w) + b


if __name__ == "__main__":
    key = jax.random.PRNGKey(0)
    N, E, Cin, Cout = 256, 1024, 16, 32

    k1, k2, k3, k4 = jax.random.split(key, 4)
    x = jax.random.normal(k1, (N, Cin), jnp.float32)
    edge_index = jax.random.randint(k2, (2, E), 0, N, jnp.int32)

    w = jax.random.normal(k3, (Cin, Cout), jnp.float32) * (1.0 / jnp.sqrt(Cin))
    b = jax.random.normal(k4, (Cout,), jnp.float32) * 0.01
    gamma = jnp.ones((Cin,), jnp.float32)   # BatchNorm weight init
    beta = jnp.zeros((Cin,), jnp.float32)   # BatchNorm bias init

    ref = reference(x, edge_index, w, b, gamma, beta)

    # Default (big-tile) path: N_p = 256 -> single grid step, VMEM-resident g.
    out = jax.block_until_ready(basic_gcn_block(x, edge_index, w, b, gamma, beta))
    assert out.shape == (N, Cout)
    err = float(jnp.max(jnp.abs(out - ref)))
    assert jnp.allclose(out, ref, atol=2e-2, rtol=2e-2), f"mismatch (max abs err {err})"

    # Small tiles + streamed g: exercises a real (2, 2) grid with k-accumulation.
    out2 = jax.block_until_ready(
        basic_gcn_block(x, edge_index, w, b, gamma, beta,
                        tm=128, tk=128, tr=128, g_resident=False))
    err2 = float(jnp.max(jnp.abs(out2 - ref)))
    assert jnp.allclose(out2, ref, atol=2e-2, rtol=2e-2), f"mismatch (max abs err {err2})"

    print("KERNEL_OK")
</pallas_src>

<mosaic_0001>
module attributes {stable_mosaic.version = 11 : i64} {
  func.func @bn_relu_proj_kernel(%arg0: i32, %arg1: memref<256x128xf32, #tpu.memory_space<vmem>>, %arg2: memref<1x128xf32, #tpu.memory_space<vmem>>, %arg3: memref<1x128xf32, #tpu.memory_space<vmem>>, %arg4: memref<128x128xf32, #tpu.memory_space<vmem>>, %arg5: memref<256x1xf32, #tpu.memory_space<vmem>>, %arg6: memref<256x128xbf16, #tpu.memory_space<vmem>>) attributes {dimension_semantics = [#tpu.dimension_semantics<parallel>], iteration_bounds = array<i64: 1>, scalar_prefetch = 0 : i64, scratch_operands = 0 : i64, tpu.core_type = #tpu.core_type<tc>, window_params = [{transform_indices = @transform_0, window_bounds = array<i64: 256, 128>}, {pipeline_mode = #tpu.pipeline_mode<synchronous>, transform_indices = @transform_1, window_bounds = array<i64: 1, 128>}, {pipeline_mode = #tpu.pipeline_mode<synchronous>, transform_indices = @transform_2, window_bounds = array<i64: 1, 128>}, {pipeline_mode = #tpu.pipeline_mode<synchronous>, transform_indices = @transform_3, window_bounds = array<i64: 128, 128>}, {transform_indices = @transform_4, window_bounds = array<i64: 256, 1>}, {transform_indices = @transform_5, window_bounds = array<i64: 256, 128>}]} {
    %c0 = arith.constant 0 : index
    %c0_0 = arith.constant 0 : index
    %0 = vector.load %arg1[%c0, %c0_0] : memref<256x128xf32, #tpu.memory_space<vmem>>, vector<256x128xf32>
    %c0_1 = arith.constant 0 : index
    %c0_2 = arith.constant 0 : index
    %1 = vector.load %arg2[%c0_1, %c0_2] : memref<1x128xf32, #tpu.memory_space<vmem>>, vector<1x128xf32>
    %2 = vector.broadcast %1 : vector<1x128xf32> to vector<256x128xf32>
    %3 = arith.mulf %0, %2 : vector<256x128xf32>
    %c0_3 = arith.constant 0 : index
    %c0_4 = arith.constant 0 : index
    %4 = vector.load %arg3[%c0_3, %c0_4] : memref<1x128xf32, #tpu.memory_space<vmem>>, vector<1x128xf32>
    %5 = vector.broadcast %4 : vector<1x128xf32> to vector<256x128xf32>
    %6 = arith.addf %3, %5 : vector<256x128xf32>
    %cst = arith.constant 0.000000e+00 : f32
    %7 = vector.broadcast %cst : f32 to vector<256x128xf32>
    %8 = arith.maximumf %6, %7 : vector<256x128xf32>
    %c0_5 = arith.constant 0 : index
    %c0_6 = arith.constant 0 : index
    %9 = vector.load %arg4[%c0_5, %c0_6] : memref<128x128xf32, #tpu.memory_space<vmem>>, vector<128x128xf32>
    %cst_7 = arith.constant dense<0.000000e+00> : vector<256x128xf32>
    %10 = tpu.matmul %8, %9, %cst_7 {dimension_numbers = #tpu.dot_dimension_numbers<[1], [0], [0], [1], [0, 0, 1, 1], [], []>} : vector<256x128xf32>, vector<128x128xf32>, vector<256x128xf32> -> vector<256x128xf32>
    %c0_8 = arith.constant 0 : index
    %c0_9 = arith.constant 0 : index
    %11 = vector.load %arg5[%c0_8, %c0_9] : memref<256x1xf32, #tpu.memory_space<vmem>>, vector<256x1xf32>
    %12 = vector.broadcast %11 : vector<256x1xf32> to vector<256x128xf32>
    %13 = arith.mulf %10, %12 : vector<256x128xf32>
    %14 = arith.truncf %13 : vector<256x128xf32> to vector<256x128xbf16>
    %c0_10 = arith.constant 0 : index
    %c0_11 = arith.constant 0 : index
    %15 = vector.load %arg6[%c0_10, %c0_11] : memref<256x128xbf16, #tpu.memory_space<vmem>>, vector<256x128xbf16>
    tpu.vector_store %arg6[%c0_10, %c0_11], %14 {strides = array<i32>} : memref<256x128xbf16, #tpu.memory_space<vmem>>, vector<256x128xbf16>,
    return
  }
  func.func @transform_0(%arg0: i32) -> (i32, i32) {
    %c0_i32 = arith.constant 0 : i32
    %c0_i32_0 = arith.constant 0 : i32
    return %arg0, %c0_i32 : i32, i32
  }
  func.func @transform_1(%arg0: i32) -> (i32, i32) {
    %c0_i32 = arith.constant 0 : i32
    %c0_i32_0 = arith.constant 0 : i32
    %c0_i32_1 = arith.constant 0 : i32
    return %c0_i32, %c0_i32_0 : i32, i32
  }
  func.func @transform_2(%arg0: i32) -> (i32, i32) {
    %c0_i32 = arith.constant 0 : i32
    %c0_i32_0 = arith.constant 0 : i32
    %c0_i32_1 = arith.constant 0 : i32
    return %c0_i32, %c0_i32_0 : i32, i32
  }
  func.func @transform_3(%arg0: i32) -> (i32, i32) {
    %c0_i32 = arith.constant 0 : i32
    %c0_i32_0 = arith.constant 0 : i32
    %c0_i32_1 = arith.constant 0 : i32
    return %c0_i32, %c0_i32_0 : i32, i32
  }
  func.func @transform_4(%arg0: i32) -> (i32, i32) {
    %c0_i32 = arith.constant 0 : i32
    %c0_i32_0 = arith.constant 0 : i32
    return %arg0, %c0_i32 : i32, i32
  }
  func.func @transform_5(%arg0: i32) -> (i32, i32) {
    %c0_i32 = arith.constant 0 : i32
    %c0_i32_0 = arith.constant 0 : i32
    return %arg0, %c0_i32 : i32, i32
  }
}

</mosaic_0001>

<bundles_post_ra>
// kernel: tpu_custom_call.1
= control target key start
LH: loop header
LB: loop body
LE: loop exit
PB: predicated region body
PF: predicated region fallthrough
CT: control target
= control target key end

     0   :  { %10 = vsyncpa [#allocation3], 0  ;;  %s1567_s0 = inlined_call_operand.vmem [shape: f32[256,128], index: 0, kind: input, shape index: {}]   ;;  %s1568_s1 = inlined_call_operand.vmem [shape: f32[1,128], index: 1, kind: input, shape index: {}]   ;;  %s1569_s2 = inlined_call_operand.vmem [shape: f32[1,128], index: 2, kind: input, shape index: {}]   ;;  %s1570_s3 = inlined_call_operand.hbm [shape: f32[128,128], index: 3, kind: input, shape index: {}]   ;;  %s1571_s4 = inlined_call_operand.vmem [shape: f32[256,1], index: 4, kind: input, shape index: {}]   ;;  %s1572_s5 = inlined_call_operand.hbm [shape: bf16[256,128], index: 5, kind: output, shape index: {}]  }
   0x1   :  { %11 = vsyncpa [#allocation4], 0  ;;  %s1213_s18 = smov [#allocation2]   ;;  %s1165_s22 = scalar_lea.hbm %s1570_s3, 2048 }
   0x2   :  { %s23_s19 = sshll.u32 %s1213_s18, 4  ;;  %p1166_p0 = scmp.ne.s32.totalorder %s1570_s3, %s1165_s22  ;;  %s24_s19 = int_to_ptr.vmem [resolvable:$true] %s23_s19 }
   0x3   :  { %p1169_p1 = scmp.lt.u32.totalorder %s1165_s22, %s1570_s3 }
   0x5   :  { %p1171_p2 = pnand %p1169_p1, %p1166_p0 }
   0x7   :  { %1174 = shalt.err (!%p1171_p2)
}
   0x8   :  { %s1175_s27 = scalar_lea.vmem %s24_s19, 2048  ;;  %p1180_p4 = scmp.lt.s32.totalorder %s24_s19, %s24_s19 }
   0x9   :  { %p1176_p3 = scmp.ne.s32.totalorder %s24_s19, %s1175_s27  ;;  %p1181_p5 = scmp.lt.s32.totalorder %s1175_s27, %s1175_s27 }
   0xb   :  { %p1182_p6 = por %p1181_p5, %p1180_p4 }
   0xd   :  { %p1183_p7 = pnand %p1182_p6, %p1176_p3 }
   0xf   :  { %1186 = shalt.err (!%p1183_p7)
}
  0x10   :  { %s1214_s28 = smov 128   ;;  %s1215_s29 = smov 8  }
  0x11   :  { %29 = dma.hbm_to_vmem [thread:$0]  %s1570_s3, 2048, %s24_s19, [#allocation3], %s1214_s28, %s1214_s28, %s1215_s29  }
  0x12   :  { %1209 = dma.done.wait [#allocation3], 2048  }
  0x13   :  { %1210 = vsyncadd [#allocation3], 4294965248  ;;  %v1216_v0 = vmov 0   ;;  %v177_v1 = vld [vmem:[#allocation2] sm:$0xff]  ;;  %v178_v2 = vld [vmem:[#allocation2 + $0x8] sm:$0xff] }
  0x14   :  { %1164 = vset.pattern.permute.xlu1 %v1216_v0  ;;  %1163 = vset.pattern.permute.xlu0 %v1216_v0  ;;  %v179_v3 = vld [vmem:[#allocation2 + $0x10] sm:$0xff]  ;;  %v1108_v4 = vpack.c.bf16 %v178_v2, %v177_v1  ;;  %v180_v5 = vld [vmem:[#allocation2 + $0x18] sm:$0xff]  ;;  %v181_v7 = vld [vmem:[#allocation2 + $0x20] sm:$0xff] }
  0x15   :  { %v1112_v6 = vpack.c.bf16 %v180_v5, %v179_v3  ;;  %v182_v8 = vld [vmem:[#allocation2 + $0x28] sm:$0xff]  ;;  %v420_v9 = vld [vmem:[%s1571_s4 + $0x10] sm:$0xff]  ;;  %v184_v12 = vld [vmem:[#allocation2 + $0x38] sm:$0xff] }
  0x16   :  { %1109 = vmatprep.subr.bf16.mxu0 %v1108_v4  ;;  %1140 = vmatprep.subr.bf16.mxu1 %v1108_v4  ;;  %v1116_v10 = vpack.c.bf16 %v182_v8, %v181_v7  ;;  %v183_v11 = vld [vmem:[#allocation2 + $0x30] sm:$0xff]  ;;  %v418_v13 = vld [vmem:[%s1571_s4] sm:$0xff]  ;;  %v421_v14 = vld [vmem:[%s1571_s4 + $0x18] sm:$0xff] }
  0x17   :  { %1111 = vmatpush3.bf16.msra.mxu0 %v1108_v4  ;;  %1148 = vmatpush3.bf16.msra.mxu1 %v1108_v4  ;;  %v419_v15 = vld [vmem:[%s1571_s4 + $0x8] sm:$0xff]  ;;  %v35_v16 = vld [vmem:[%s1567_s0] sm:$0xff]  ;;  %v1120_v22 = vpack.c.bf16 %v184_v12, %v183_v11  ;;  %v187_v32 = vld [vmem:[#allocation2 + $0x50] sm:$0xff] }
  0x18   :  { %1113 = vmatprep.subr.bf16.mxu0 %v1112_v6  ;;  %1141 = vmatprep.subr.bf16.mxu1 %v1112_v6  ;;  %v1280_v17 = vld [vmem:[%s1568_s1] ss:$0 sm:$0xff]  ;;  %v186_v24 = vld [vmem:[#allocation2 + $0x48] sm:$0xff]  ;;  %v188_v33 = vld [vmem:[#allocation2 + $0x58] sm:$0xff] }
  0x19   :  { %462 = vperm.xlu1 %1164, %v420_v9   ;;  %452 = vperm.xlu0 %1163, %v418_v13   ;;  %v1285_v18 = vld [vmem:[%s1569_s2] ss:$0 sm:$0xff]  ;;  %v74_v20 = vmul.f32 %v1280_v17, %v35_v16  ;;  %v423_v29 = vld [vmem:[%s1571_s4 + $0x28] sm:$0xff]  ;;  %v425_v34 = vld [vmem:[%s1571_s4 + $0x38] sm:$0xff]  ;;  %v1128_v36 = vpack.c.bf16 %v188_v33, %v187_v32 }
  0x1a   :  { %v51_v19 = vld [vmem:[%s1567_s0 + $0x80] sm:$0xff]  ;;  %v424_v35 = vld [vmem:[%s1571_s4 + $0x30] sm:$0xff]  ;;  %v190_v38 = vld [vmem:[#allocation2 + $0x68] sm:$0xff] }
  0x1b   :  { %1115 = vmatpush3.bf16.msra.mxu0 %v1112_v6  ;;  %1149 = vmatpush3.bf16.msra.mxu1 %v1112_v6  ;;  %v90_v21 = vmul.f32 %v1280_v17, %v51_v19  ;;  %v185_v23 = vld [vmem:[#allocation2 + $0x40] sm:$0xff]  ;;  %v113_v25 = vadd.f32 %v1285_v18, %v74_v20  ;;  %v36_v39 = vld [vmem:[%s1567_s0 + $0x8] sm:$0xff]  ;;  %v37_v44 = vld [vmem:[%s1567_s0 + $0x10] sm:$0xff] }
  0x1c   :  { %1117 = vmatprep.subr.bf16.mxu0 %v1116_v10  ;;  %1142 = vmatprep.subr.bf16.mxu1 %v1116_v10  ;;  %v422_v30 = vld [vmem:[%s1571_s4 + $0x20] sm:$0xff]  ;;  %v1124_v31 = vpack.c.bf16 %v186_v24, %v185_v23  ;;  %v52_v40 = vld [vmem:[%s1567_s0 + $0x88] sm:$0xff]  ;;  %v53_v45 = vld [vmem:[%s1567_s0 + $0x90] sm:$0xff]  ;;  %v75_v48 = vmul.f32 %v1280_v17, %v36_v39  ;;  %v76_v52 = vmul.f32 %v1280_v17, %v37_v44 }
  0x1d   :  { %467 = vperm.xlu1 %1164, %v421_v14   ;;  %457 = vperm.xlu0 %1163, %v419_v15   ;;  %v129_v26 = vadd.f32 %v1285_v18, %v90_v21  ;;  %v145_v27 = vmax.f32 %v113_v25, 0.0  ;;  %v189_v37 = vld [vmem:[#allocation2 + $0x60] sm:$0xff]  ;;  %v427_v41 = vld [vmem:[%s1571_s4 + $0x48] sm:$0xff]  ;;  %v191_v46 = vld [vmem:[#allocation2 + $0x70] sm:$0xff]  ;;  %v91_v49 = vmul.f32 %v1280_v17, %v52_v40  ;;  %v92_v53 = vmul.f32 %v1280_v17, %v53_v45 }
  0x1e   :  { %v426_v42 = vld [vmem:[%s1571_s4 + $0x40] sm:$0xff]  ;;  %v1132_v43 = vpack.c.bf16 %v190_v38, %v189_v37  ;;  %v192_v47 = vld [vmem:[#allocation2 + $0x78] sm:$0xff]  ;;  %v428_v56 = vld [vmem:[%s1571_s4 + $0x50] sm:$0xff]  ;;  %v114_v59 = vadd.f32 %v1285_v18, %v75_v48  ;;  %v115_v2 = vadd.f32 %v1285_v18, %v76_v52 }
  0x1f   :  { %1119 = vmatpush3.bf16.msra.mxu0 %v1116_v10  ;;  %1150 = vmatpush3.bf16.msra.mxu1 %v1116_v10  ;;  %v161_v28 = vmax.f32 %v129_v26, 0.0  ;;  %v38_v50 = vld [vmem:[%s1567_s0 + $0x18] sm:$0xff]  ;;  %v39_v54 = vld [vmem:[%s1567_s0 + $0x20] sm:$0xff]  ;;  %v1136_v57 = vpack.c.bf16 %v192_v47, %v191_v46  ;;  %v130_v62 = vadd.f32 %v1285_v18, %v91_v49  ;;  %v40_v0 = vld [vmem:[%s1567_s0 + $0x28] sm:$0xff]  ;;  %v131_v3 = vadd.f32 %v1285_v18, %v92_v53 }
  0x20   :  { %1121 = vmatprep.subr.bf16.mxu0 %v1120_v22  ;;  %1143 = vmatprep.subr.bf16.mxu1 %v1120_v22  ;;  %v54_v51 = vld [vmem:[%s1567_s0 + $0x98] sm:$0xff]  ;;  %v55_v58 = vld [vmem:[%s1567_s0 + $0xa0] sm:$0xff]  ;;  %v77_v60 = vmul.f32 %v1280_v17, %v38_v50  ;;  %v78_v63 = vmul.f32 %v1280_v17, %v39_v54  ;;  %v56_v1 = vld [vmem:[%s1567_s0 + $0xa8] sm:$0xff]  ;;  %v146_v9 = vmax.f32 %v114_v59, 0.0  ;;  %v79_v12 = vmul.f32 %v1280_v17, %v40_v0 }
  0x21   :  { %1060 = vmatprep.mubr.f32.mxu0 %v145_v27  ;;  %1084 = vmatprep.mubr.f32.mxu1 %v161_v28  ;;  %v429_v55 = vld [vmem:[%s1571_s4 + $0x58] sm:$0xff]  ;;  %v93_v61 = vmul.f32 %v1280_v17, %v54_v51  ;;  %v94_v4 = vmul.f32 %v1280_v17, %v55_v58  ;;  %v41_v5 = vld [vmem:[%s1567_s0 + $0x30] sm:$0xff]  ;;  %v431_v6 = vld [vmem:[%s1571_s4 + $0x68] sm:$0xff]  ;;  %v162_v13 = vmax.f32 %v130_v62, 0.0  ;;  %v95_v15 = vmul.f32 %v1280_v17, %v56_v1 }
  0x22   :  { %477 = vperm.xlu1 %1164, %v423_v29   ;;  %472 = vperm.xlu0 %1163, %v422_v30   ;;  %v430_v7 = vld [vmem:[%s1571_s4 + $0x60] sm:$0xff]  ;;  %v57_v8 = vld [vmem:[%s1567_s0 + $0xb0] sm:$0xff]  ;;  %v116_v10 = vadd.f32 %v1285_v18, %v77_v60  ;;  %v117_v14 = vadd.f32 %v1285_v18, %v78_v63  ;;  %v80_v16 = vmul.f32 %v1280_v17, %v41_v5  ;;  %v42_v19 = vld [vmem:[%s1567_s0 + $0x38] sm:$0xff]  ;;  %v147_v20 = vmax.f32 %v115_v2, 0.0 }
  0x23   :  { %1123 = vmatpush3.bf16.msra.mxu0 %v1120_v22  ;;  %1151 = vmatpush3.bf16.msra.mxu1 %v1120_v22  ;;  %v132_v11 = vadd.f32 %v1285_v18, %v93_v61  ;;  %v163_v21 = vmax.f32 %v131_v3, 0.0  ;;  %v133_v22 = vadd.f32 %v1285_v18, %v94_v4  ;;  %v96_v23 = vmul.f32 %v1280_v17, %v57_v8  ;;  %v58_v24 = vld [vmem:[%s1567_s0 + $0xb8] sm:$0xff]  ;;  %v43_v25 = vld [vmem:[%s1567_s0 + $0x40] sm:$0xff]  ;;  %v432_v32 = vld [vmem:[%s1571_s4 + $0x70] sm:$0xff] }
  0x24   :  { %1125 = vmatprep.subr.bf16.mxu0 %v1124_v31  ;;  %1144 = vmatprep.subr.bf16.mxu1 %v1124_v31  ;;  %v59_v26 = vld [vmem:[%s1567_s0 + $0xc0] sm:$0xff]  ;;  %v148_v27 = vmax.f32 %v116_v10, 0.0  ;;  %v118_v29 = vadd.f32 %v1285_v18, %v79_v12  ;;  %v81_v30 = vmul.f32 %v1280_v17, %v42_v19  ;;  %v149_v33 = vmax.f32 %v117_v14, 0.0  ;;  %v44_v37 = vld [vmem:[%s1567_s0 + $0x48] sm:$0xff]  ;;  %v61_v44 = vld [vmem:[%s1567_s0 + $0xd0] sm:$0xff] }
  0x25   :  { %v164_v28 = vmax.f32 %v132_v11, 0.0  ;;  %v60_v38 = vld [vmem:[%s1567_s0 + $0xc8] sm:$0xff]  ;;  %v165_v39 = vmax.f32 %v133_v22, 0.0  ;;  %v135_v40 = vadd.f32 %v1285_v18, %v96_v23  ;;  %v83_v47 = vmul.f32 %v1280_v17, %v44_v37  ;;  %v434_v50 = vld [vmem:[%s1571_s4 + $0x80] sm:$0xff]  ;;  %v62_v60 = vld [vmem:[%s1567_s0 + $0xd8] sm:$0xff] }
  0x26   :  { %487 = vperm.xlu1 %1164, %v425_v34   ;;  %482 = vperm.xlu0 %1163, %v424_v35   ;;  %v134_v34 = vadd.f32 %v1285_v18, %v95_v15  ;;  %v119_v35 = vadd.f32 %v1285_v18, %v80_v16  ;;  %v150_v45 = vmax.f32 %v118_v29, 0.0  ;;  %v120_v46 = vadd.f32 %v1285_v18, %v81_v30  ;;  %v435_v49 = vld [vmem:[%s1571_s4 + $0x88] sm:$0xff]  ;;  %v47_v61 = vld [vmem:[%s1567_s0 + $0x60] sm:$0xff]  ;;  %v437_v3 = vld [vmem:[%s1571_s4 + $0x98] sm:$0xff] }
  0x27   :  { %1127 = vmatpush3.bf16.msra.mxu0 %v1124_v31  ;;  %1152 = vmatpush3.bf16.msra.mxu1 %v1124_v31  ;;  %v433_v31 = vld [vmem:[%s1571_s4 + $0x78] sm:$0xff]  ;;  %v99_v48 = vmul.f32 %v1280_v17, %v60_v38  ;;  %v100_v59 = vmul.f32 %v1280_v17, %v61_v44  ;;  %v63_v62 = vld [vmem:[%s1567_s0 + $0xe0] sm:$0xff]  ;;  %v122_v0 = vadd.f32 %v1285_v18, %v83_v47  ;;  %v436_v4 = vld [vmem:[%s1571_s4 + $0x90] sm:$0xff] }
  0x28   :  { %1129 = vmatprep.subr.bf16.mxu0 %v1128_v36  ;;  %1145 = vmatprep.subr.bf16.mxu1 %v1128_v36  ;;  %v166_v51 = vmax.f32 %v134_v34, 0.0  ;;  %v151_v52 = vmax.f32 %v119_v35, 0.0  ;;  %v152_v63 = vmax.f32 %v120_v46, 0.0  ;;  %v86_v8 = vmul.f32 %v1280_v17, %v47_v61  ;;  %v64_v14 = vld [vmem:[%s1567_s0 + $0xe8] sm:$0xff]  ;;  %v49_v15 = vld [vmem:[%s1567_s0 + $0x70] sm:$0xff]  ;;  %v66_v34 = vld [vmem:[%s1567_s0 + $0xf8] sm:$0xff] }
  0x29   :  { %v138_v1 = vadd.f32 %v1285_v18, %v99_v48  ;;  %v139_v12 = vadd.f32 %v1285_v18, %v100_v59  ;;  %v65_v16 = vld [vmem:[%s1567_s0 + $0xf0] sm:$0xff]  ;;  %v154_v19 = vmax.f32 %v122_v0, 0.0  ;;  %v439_v23 = vld [vmem:[%s1571_s4 + $0xa8] sm:$0xff]  ;;  %v441_v37 = vld [vmem:[%s1571_s4 + $0xb8] sm:$0xff] }
  0x2a   :  { %497 = vperm.xlu1 %1164, %v427_v41   ;;  %492 = vperm.xlu0 %1163, %v426_v42   ;;  %v82_v41 = vmul.f32 %v1280_v17, %v43_v25  ;;  %v98_v42 = vmul.f32 %v1280_v17, %v59_v26  ;;  %v440_v38 = vld [vmem:[%s1571_s4 + $0xb0] sm:$0xff]  ;;  %v443_v47 = vld [vmem:[%s1571_s4 + $0xc8] sm:$0xff]  ;;  %v442_v48 = vld [vmem:[%s1571_s4 + $0xc0] sm:$0xff] }
  0x2b   :  { %1131 = vmatpush3.bf16.msra.mxu0 %v1128_v36  ;;  %1153 = vmatpush3.bf16.msra.mxu1 %v1128_v36  ;;  %v97_v36 = vmul.f32 %v1280_v17, %v58_v24  ;;  %v438_v24 = vld [vmem:[%s1571_s4 + $0xa0] sm:$0xff]  ;;  %v171_v29 = vmax.f32 %v139_v12, 0.0  ;;  %v449_v59 = vld [vmem:[%s1571_s4 + $0xf8] sm:$0xff] }
  0x2c   :  { %1133 = vmatprep.subr.bf16.mxu0 %v1132_v43  ;;  %1146 = vmatprep.subr.bf16.mxu1 %v1132_v43  ;;  %v137_v58 = vadd.f32 %v1285_v18, %v98_v42  ;;  %v105_v42 = vmul.f32 %v1280_v17, %v66_v34 }
  0x2d   :  { %v136_v53 = vadd.f32 %v1285_v18, %v97_v36 }
  0x2e   :  { %507 = vperm.xlu1 %1164, %v429_v55   ;;  %502 = vperm.xlu0 %1163, %v428_v56   ;;  %v46_v55 = vld [vmem:[%s1567_s0 + $0x58] sm:$0xff]  ;;  %v167_v56 = vmax.f32 %v135_v40, 0.0  ;;  %v169_v11 = vmax.f32 %v137_v58, 0.0  ;;  %v446_v58 = vld [vmem:[%s1571_s4 + $0xe0] sm:$0xff] }
  0x2f   :  { %1135 = vmatpush3.bf16.msra.mxu0 %v1132_v43  ;;  %1154 = vmatpush3.bf16.msra.mxu1 %v1132_v43  ;;  %v45_v43 = vld [vmem:[%s1567_s0 + $0x50] sm:$0xff]  ;;  %v85_v2 = vmul.f32 %v1280_v17, %v46_v55  ;;  %v168_v5 = vmax.f32 %v136_v53, 0.0 }
  0x30   :  { %1137 = vmatprep.subr.bf16.mxu0 %v1136_v57  ;;  %1147 = vmatprep.subr.bf16.mxu1 %v1136_v57  ;;  %v84_v54 = vmul.f32 %v1280_v17, %v45_v43  ;;  %v444_v55 = vld [vmem:[%s1571_s4 + $0xd0] sm:$0xff] }
  0x32   :  { %517 = vperm.xlu1 %1164, %v431_v6   ;;  %512 = vperm.xlu0 %1163, %v430_v7   ;;  %v123_v6 = vadd.f32 %v1285_v18, %v84_v54  ;;  %v101_v7 = vmul.f32 %v1280_v17, %v62_v60  ;;  %v445_v54 = vld [vmem:[%s1571_s4 + $0xd8] sm:$0xff]  ;;  %v448_v60 = vld [vmem:[%s1571_s4 + $0xf0] sm:$0xff] }
  0x33   :  { %1139 = vmatpush3.bf16.msra.mxu0 %v1136_v57  ;;  %1155 = vmatpush3.bf16.msra.mxu1 %v1136_v57  ;;  %v121_v57 = vadd.f32 %v1285_v18, %v82_v41 }
  0x34   :  { %v155_v25 = vmax.f32 %v123_v6, 0.0  ;;  %v140_v26 = vadd.f32 %v1285_v18, %v101_v7 }
  0x35   :  { %v153_v10 = vmax.f32 %v121_v57, 0.0 }
  0x36   :  { %1061 = vmatmul.mubr.f32.vlgmr.msra.gmra.mrb[0].mxu0 %v146_v9  ;;  %1085 = vmatmul.mubr.f32.vlgmr.msra.gmra.mrb[0].mxu1 %v162_v13  ;;  %v48_v9 = vld [vmem:[%s1567_s0 + $0x68] sm:$0xff]  ;;  %v102_v13 = vmul.f32 %v1280_v17, %v63_v62 }
  0x37   :  { %1063 = vmatprep.mubr.f32.mxu0 %v147_v20  ;;  %1087 = vmatprep.mubr.f32.mxu1 %v163_v21  ;;  %v170_v20 = vmax.f32 %v138_v1, 0.0  ;;  %v124_v21 = vadd.f32 %v1285_v18, %v85_v2  ;;  %v87_v22 = vmul.f32 %v1280_v17, %v48_v9 }
  0x38   :  { %527 = vperm.xlu1 %1164, %v433_v31   ;;  %522 = vperm.xlu0 %1163, %v432_v32   ;;  %v141_v30 = vadd.f32 %v1285_v18, %v102_v13  ;;  %v88_v31 = vmul.f32 %v1280_v17, %v49_v15  ;;  %v104_v32 = vmul.f32 %v1280_v17, %v65_v16 }
  0x39   :  { %v156_v35 = vmax.f32 %v124_v21, 0.0  ;;  %v126_v36 = vadd.f32 %v1285_v18, %v87_v22 }
  0x3a   :  { %1064 = vmatmul.mubr.f32.gmra.mrb[2].mxu0 %v148_v27  ;;  %1088 = vmatmul.mubr.f32.gmra.mrb[2].mxu1 %v164_v28  ;;  %v125_v27 = vadd.f32 %v1285_v18, %v86_v8  ;;  %v103_v28 = vmul.f32 %v1280_v17, %v64_v14  ;;  %v173_v44 = vmax.f32 %v141_v30, 0.0  ;;  %v143_v46 = vadd.f32 %v1285_v18, %v104_v32 }
  0x3b   :  { %1066 = vmatprep.mubr.f32.mxu0 %v149_v33  ;;  %1090 = vmatprep.mubr.f32.mxu1 %v165_v39  ;;  %v50_v33 = vld [vmem:[%s1567_s0 + $0x78] sm:$0xff]  ;;  %v172_v39 = vmax.f32 %v140_v26, 0.0 }
  0x3c   :  { %537 = vperm.xlu1 %1164, %v435_v49   ;;  %532 = vperm.xlu0 %1163, %v434_v50   ;;  %v142_v40 = vadd.f32 %v1285_v18, %v103_v28  ;;  %v89_v41 = vmul.f32 %v1280_v17, %v50_v33  ;;  %v157_v43 = vmax.f32 %v125_v27, 0.0  ;;  %v158_v17 = vmax.f32 %v126_v36, 0.0 }
  0x3d   :  { %v175_v53 = vmax.f32 %v143_v46, 0.0 }
  0x3e   :  { %1067 = vmatmul.mubr.f32.gmra.mrb[4].mxu0 %v150_v45  ;;  %1091 = vmatmul.mubr.f32.gmra.mrb[4].mxu1 %v166_v51  ;;  %v127_v45 = vadd.f32 %v1285_v18, %v88_v31  ;;  %v174_v49 = vmax.f32 %v142_v40, 0.0  ;;  %v128_v50 = vadd.f32 %v1285_v18, %v89_v41  ;;  %v144_v51 = vadd.f32 %v1285_v18, %v105_v42  ;;  %v447_v18 = vld [vmem:[%s1571_s4 + $0xe8] sm:$0xff]  ;;  %s1217_s4 = smov [#allocation5]  }
  0x3f   :  { %1069 = vmatprep.mubr.f32.mxu0 %v151_v52  ;;  %1093 = vmatprep.mubr.f32.mxu1 %v167_v56  ;;  %s807_s23 = sshll.u32 %s1217_s4, 4  ;;  %s808_s23 = int_to_ptr.vmem [resolvable:$true] %s807_s23 }
  0x40   :  { %547 = vperm.xlu1 %1164, %v437_v3   ;;  %542 = vperm.xlu0 %1163, %v436_v4   ;;  %v159_v52 = vmax.f32 %v127_v45, 0.0  ;;  %v160_v56 = vmax.f32 %v128_v50, 0.0  ;;  %v176_v57 = vmax.f32 %v144_v51, 0.0  ;;  %s1187_s24 = scalar_lea.vmem %s808_s23, 2048  ;;  %p1192_p9 = scmp.lt.s32.totalorder %s808_s23, %s808_s23 }
  0x41   :  { %p1188_p8 = scmp.ne.s32.totalorder %s808_s23, %s1187_s24  ;;  %p1193_p10 = scmp.lt.s32.totalorder %s1187_s24, %s1187_s24 }
  0x42   :  { %1070 = vmatmul.mubr.f32.gmra.mrb[6].mxu0 %v152_v63  ;;  %1094 = vmatmul.mubr.f32.gmra.mrb[6].mxu1 %v168_v5 }
  0x43   :  { %1072 = vmatprep.mubr.f32.mxu0 %v153_v10  ;;  %1096 = vmatprep.mubr.f32.mxu1 %v169_v11  ;;  %p1194_p11 = por %p1193_p10, %p1192_p9 }
  0x44   :  { %557 = vperm.xlu1 %1164, %v439_v23   ;;  %552 = vperm.xlu0 %1163, %v438_v24  }
  0x45   :  { %p1195_p12 = pnand %p1194_p11, %p1188_p8 }
  0x46   :  { %1073 = vmatmul.mubr.f32.gmra.mrb[8].mxu0 %v154_v19  ;;  %1097 = vmatmul.mubr.f32.gmra.mrb[8].mxu1 %v170_v20 }
  0x47   :  { %1075 = vmatprep.mubr.f32.mxu0 %v155_v25  ;;  %1099 = vmatprep.mubr.f32.mxu1 %v171_v29 }
  0x48   :  { %567 = vperm.xlu1 %1164, %v441_v37   ;;  %562 = vperm.xlu0 %1163, %v440_v38  }
  0x4a   :  { %1076 = vmatmul.mubr.f32.gmra.mrb[10].mxu0 %v156_v35  ;;  %1100 = vmatmul.mubr.f32.gmra.mrb[10].mxu1 %v172_v39 }
  0x4b   :  { %1078 = vmatprep.mubr.f32.mxu0 %v157_v43  ;;  %1102 = vmatprep.mubr.f32.mxu1 %v173_v44 }
  0x4c   :  { %577 = vperm.xlu1 %1164, %v443_v47   ;;  %572 = vperm.xlu0 %1163, %v442_v48  }
  0x4e   :  { %1079 = vmatmul.mubr.f32.gmra.mrb[12].mxu0 %v158_v17  ;;  %1103 = vmatmul.mubr.f32.gmra.mrb[12].mxu1 %v174_v49 }
  0x4f   :  { %1081 = vmatprep.mubr.f32.mxu0 %v159_v52  ;;  %1105 = vmatprep.mubr.f32.mxu1 %v175_v53 }
  0x50   :  { %587 = vperm.xlu1 %1164, %v445_v54   ;;  %582 = vperm.xlu0 %1163, %v444_v55  }
  0x52   :  { %1082 = vmatmul.mubr.f32.gmra.mrb[14].mxu0 %v160_v56  ;;  %1106 = vmatmul.mubr.f32.gmra.mrb[14].mxu1 %v176_v57 }
  0x54   :  { %597 = vperm.xlu1 %1164, %v447_v18   ;;  %592 = vperm.xlu0 %1163, %v446_v58  }
  0x58   :  { %607 = vperm.xlu1 %1164, %v449_v59   ;;  %602 = vperm.xlu0 %1163, %v448_v60  }
  0x98   :  { %v463_v61 = vpop.permute.xlu1 %462  ;;  %v453_v62 = vpop.permute.xlu0 %452 }
  0x9c   :  { %v468_v63 = vpop.permute.xlu1 %467  ;;  %v458_v0 = vpop.permute.xlu0 %457 }
  0xa1   :  { %v478_v1 = vpop.permute.xlu1 %477  ;;  %v473_v2 = vpop.permute.xlu0 %472 }
  0xa5   :  { %v488_v3 = vpop.permute.xlu1 %487  ;;  %v1528_v4 = vpop.permute.xlu0 %482 }
  0xa9   :  { %v1530_v5 = vpop.permute.xlu1 %497  ;;  %v1532_v6 = vpop.permute.xlu0 %492 }
  0xad   :  { %v1534_v7 = vpop.permute.xlu1 %507  ;;  %v1536_v8 = vpop.permute.xlu0 %502 }
  0xb1   :  { %v1538_v9 = vpop.permute.xlu1 %517  ;;  %v1540_v10 = vpop.permute.xlu0 %512 }
  0xb7   :  { %v1542_v11 = vpop.permute.xlu1 %527  ;;  %v1544_v12 = vpop.permute.xlu0 %522 }
  0xbb   :  { %v538_v13 = vpop.permute.xlu1 %537  ;;  %v533_v14 = vpop.permute.xlu0 %532 }
  0xbf   :  { %v548_v15 = vpop.permute.xlu1 %547  ;;  %v543_v16 = vpop.permute.xlu0 %542 }
  0xc3   :  { %v558_v19 = vpop.permute.xlu1 %557  ;;  %v553_v20 = vpop.permute.xlu0 %552 }
  0xc7   :  { %v568_v21 = vpop.permute.xlu1 %567  ;;  %v563_v22 = vpop.permute.xlu0 %562 }
  0xcb   :  { %v578_v31 = vpop.permute.xlu1 %577  ;;  %v573_v32 = vpop.permute.xlu0 %572 }
  0xcf   :  { %v588_v52 = vpop.permute.xlu1 %587  ;;  %v583_v53 = vpop.permute.xlu0 %582 }
 0x109   :  { %v1062_v23 = vpop.f32.mrb[0].mxu0  ;;  %v1086_v24 = vpop.f32.mrb[0].mxu1 }
 0x10a   :  { %v611_v25 = vmul.f32 %v1062_v23, %v458_v0  ;;  %v627_v26 = vmul.f32 %v1086_v24, %v538_v13  ;;  %v259_v27 = vpop.f32.mrb[1].mxu0  ;;  %v339_v28 = vpop.f32.mrb[1].mxu1 }
 0x10b   :  { %v610_v29 = vmul.f32 %v453_v62, %v259_v27  ;;  %v626_v30 = vmul.f32 %v533_v14, %v339_v28 }
 0x10d   :  { %v888_v33 = vpack.c.bf16 %v611_v25, %v610_v29  ;;  %v928_v34 = vpack.c.bf16 %v627_v26, %v626_v30  ;;  %v1065_v35 = vpop.f32.mrb[2].mxu0  ;;  %v1089_v36 = vpop.f32.mrb[2].mxu1 }
 0x10e   :  { %v613_v37 = vmul.f32 %v1065_v35, %v468_v63  ;;  %v629_v38 = vmul.f32 %v1089_v36, %v548_v15  ;;  %v269_v39 = vpop.f32.mrb[3].mxu0  ;;  %v349_v40 = vpop.f32.mrb[3].mxu1 }
 0x10f   :  { %889 = vst [vmem:[#allocation5] sm:$0xff] %v888_v33   ;;  %972 = vst [vmem:[#allocation5 + $0x40] sm:$0xff] %v928_v34   ;;  %v612_v41 = vmul.f32 %v463_v61, %v269_v39  ;;  %v628_v42 = vmul.f32 %v543_v16, %v349_v40 }
 0x111   :  { %v893_v43 = vpack.c.bf16 %v613_v37, %v612_v41  ;;  %v933_v44 = vpack.c.bf16 %v629_v38, %v628_v42  ;;  %v1068_v45 = vpop.f32.mrb[4].mxu0  ;;  %v1092_v46 = vpop.f32.mrb[4].mxu1 }
 0x112   :  { %v615_v47 = vmul.f32 %v1068_v45, %v478_v1  ;;  %v631_v48 = vmul.f32 %v1092_v46, %v558_v19  ;;  %v279_v17 = vpop.f32.mrb[5].mxu0  ;;  %v359_v49 = vpop.f32.mrb[5].mxu1 }
 0x113   :  { %965 = vst [vmem:[#allocation5 + $0x8] sm:$0xff] %v893_v43   ;;  %973 = vst [vmem:[#allocation5 + $0x48] sm:$0xff] %v933_v44   ;;  %v614_v50 = vmul.f32 %v473_v2, %v279_v17  ;;  %v630_v51 = vmul.f32 %v553_v20, %v359_v49  ;;  %v598_v20 = vpop.permute.xlu1 %597 }
 0x115   :  { %v898_v54 = vpack.c.bf16 %v615_v47, %v614_v50  ;;  %v938_v55 = vpack.c.bf16 %v631_v48, %v630_v51  ;;  %v1071_v56 = vpop.f32.mrb[6].mxu0  ;;  %v1095_v57 = vpop.f32.mrb[6].mxu1 }
 0x116   :  { %v617_v18 = vmul.f32 %v1071_v56, %v488_v3  ;;  %v633_v58 = vmul.f32 %v1095_v57, %v568_v21  ;;  %v289_v59 = vpop.f32.mrb[7].mxu0  ;;  %v369_v60 = vpop.f32.mrb[7].mxu1 }
 0x117   :  { %966 = vst [vmem:[#allocation5 + $0x10] sm:$0xff] %v898_v54   ;;  %974 = vst [vmem:[#allocation5 + $0x50] sm:$0xff] %v938_v55   ;;  %v616_v61 = vmul.f32 %v1528_v4, %v289_v59  ;;  %v632_v62 = vmul.f32 %v563_v22, %v369_v60  ;;  %v593_v21 = vpop.permute.xlu0 %592  ;;  %v608_v38 = vpop.permute.xlu1 %607 }
 0x119   :  { %v903_v63 = vpack.c.bf16 %v617_v18, %v616_v61  ;;  %v943_v0 = vpack.c.bf16 %v633_v58, %v632_v62  ;;  %v1074_v1 = vpop.f32.mrb[8].mxu0  ;;  %v1098_v2 = vpop.f32.mrb[8].mxu1 }
 0x11a   :  { %v619_v13 = vmul.f32 %v1074_v1, %v1530_v5  ;;  %v635_v14 = vmul.f32 %v1098_v2, %v578_v31  ;;  %v299_v15 = vpop.f32.mrb[9].mxu0  ;;  %v379_v16 = vpop.f32.mrb[9].mxu1 }
 0x11b   :  { %967 = vst [vmem:[#allocation5 + $0x18] sm:$0xff] %v903_v63   ;;  %975 = vst [vmem:[#allocation5 + $0x58] sm:$0xff] %v943_v0   ;;  %v618_v3 = vmul.f32 %v1532_v6, %v299_v15  ;;  %v634_v19 = vmul.f32 %v573_v32, %v379_v16  ;;  %v603_v39 = vpop.permute.xlu0 %602 }
 0x11d   :  { %v908_v23 = vpack.c.bf16 %v619_v13, %v618_v3  ;;  %v948_v24 = vpack.c.bf16 %v635_v14, %v634_v19  ;;  %v1077_v4 = vpop.f32.mrb[10].mxu0  ;;  %v1101_v22 = vpop.f32.mrb[10].mxu1 }
 0x11e   :  { %v621_v25 = vmul.f32 %v1077_v4, %v1534_v7  ;;  %v637_v26 = vmul.f32 %v1101_v22, %v588_v52  ;;  %v309_v27 = vpop.f32.mrb[11].mxu0  ;;  %v389_v28 = vpop.f32.mrb[11].mxu1 }
 0x11f   :  { %968 = vst [vmem:[#allocation5 + $0x20] sm:$0xff] %v908_v23   ;;  %976 = vst [vmem:[#allocation5 + $0x60] sm:$0xff] %v948_v24   ;;  %v620_v5 = vmul.f32 %v1536_v8, %v309_v27  ;;  %v636_v29 = vmul.f32 %v583_v53, %v389_v28 }
 0x121   :  { %v913_v30 = vpack.c.bf16 %v621_v25, %v620_v5  ;;  %v953_v31 = vpack.c.bf16 %v637_v26, %v636_v29  ;;  %v1080_v6 = vpop.f32.mrb[12].mxu0  ;;  %v1104_v32 = vpop.f32.mrb[12].mxu1 }
 0x122   :  { %v623_v33 = vmul.f32 %v1080_v6, %v1538_v9  ;;  %v639_v34 = vmul.f32 %v1104_v32, %v598_v20  ;;  %v319_v35 = vpop.f32.mrb[13].mxu0  ;;  %v399_v36 = vpop.f32.mrb[13].mxu1 }
 0x123   :  { %969 = vst [vmem:[#allocation5 + $0x28] sm:$0xff] %v913_v30   ;;  %977 = vst [vmem:[#allocation5 + $0x68] sm:$0xff] %v953_v31   ;;  %v622_v7 = vmul.f32 %v1540_v10, %v319_v35  ;;  %v638_v37 = vmul.f32 %v593_v21, %v399_v36 }
 0x125   :  { %v918_v40 = vpack.c.bf16 %v623_v33, %v622_v7  ;;  %v958_v41 = vpack.c.bf16 %v639_v34, %v638_v37  ;;  %v1083_v8 = vpop.f32.mrb[14].mxu0  ;;  %v1107_v42 = vpop.f32.mrb[14].mxu1 }
 0x126   :  { %v625_v43 = vmul.f32 %v1083_v8, %v1542_v11  ;;  %v641_v44 = vmul.f32 %v1107_v42, %v608_v38  ;;  %v329_v9 = vpop.f32.mrb[15].mxu0  ;;  %v409_v45 = vpop.f32.mrb[15].mxu1 }
 0x127   :  { %970 = vst [vmem:[#allocation5 + $0x30] sm:$0xff] %v918_v40   ;;  %978 = vst [vmem:[#allocation5 + $0x70] sm:$0xff] %v958_v41   ;;  %v624_v46 = vmul.f32 %v1544_v12, %v329_v9  ;;  %v640_v47 = vmul.f32 %v603_v39, %v409_v45 }
 0x129   :  { %v923_v10 = vpack.c.bf16 %v625_v43, %v624_v46  ;;  %v963_v48 = vpack.c.bf16 %v641_v44, %v640_v47 }
 0x12b   :  { %971 = vst [vmem:[#allocation5 + $0x38] sm:$0xff] %v923_v10   ;;  %979 = vst [vmem:[#allocation5 + $0x78] sm:$0xff] %v963_v48  }
 0x12c   :  { %1198 = shalt.err (!%p1195_p12)
}
 0x12d   :  { %s1199_s27 = scalar_lea.hbm %s1572_s5, 2048 }
 0x12e   :  { %p1200_p13 = scmp.ne.s32.totalorder %s1572_s5, %s1199_s27  ;;  %p1203_p0 = scmp.lt.u32.totalorder %s1199_s27, %s1572_s5 }
 0x130   :  { %p1205_p1 = pnand %p1203_p0, %p1200_p13 }
 0x132   :  { %1208 = shalt.err (!%p1205_p1)
}
 0x133   :  { %s1218_s7 = smov 64   ;;  %s1219_s8 = smov 4  }
 0x134   :  { %813 = dma.vmem_to_hbm [thread:$0]  %s808_s23, 2048, %s1572_s5, [#allocation4], %s1218_s7, %s1218_s7, %s1219_s8  }
 0x135   :  { %1211 = dma.done.wait [#allocation4], 2048  }
 0x136   :  { %1212 = vsyncadd [#allocation4], 4294965248 }
 0x137   :  { %817 = vsyncpa [#allocation3], 1 }
 0x138   :  { %818 = vsyncpa [#allocation4], 1 }

</bundles_post_ra>
